<compile_context>
chip_gen: v7x
topology: tpu7x:2x2x1
jax: 0.10.0
libtpu: 0.0.40
codegen_flags: <defaults>
</compile_context>

<pallas_src>
import math

import jax
import jax.numpy as jnp
import numpy as np
from jax import lax
from jax.experimental import pallas as pl
from jax.experimental.pallas import tpu as pltpu

B, S, H, V = 2, 128, 128, 32  # batch, seq, hidden, vocab (small synthetic sizes)
C_PAD = 8                     # qa channels (2) padded to one full sublane tile


def qa_kernel(ids_ref, emb_tbl_ref, w_enc_ref, b_enc_ref, w_qa_t_ref, out_ref):
    # ids_ref:     (B*S, 1) int32   token ids for the whole batch
    # emb_tbl_ref: (V, H)   bf16    embedding table
    # w_enc_ref:   (H, H)   bf16    stand-in encoder weight
    # b_enc_ref:   (1, H)   f32     stand-in encoder bias
    # w_qa_t_ref:  (C_PAD, H) f32   qa_outputs weight, transposed + zero-padded
    # out_ref:     (B, C_PAD, S) f32 per-batch, per-channel softmax over seq

    ids = ids_ref[...]                                            # (B*S, 1)
    iota = lax.broadcasted_iota(jnp.int32, (B * S, V), 1)         # (B*S, V)
    # attention_mask = where(input_ids > 0, 1, 0) folded into the one-hot:
    # padding rows (id == 0) become all-zero, so their embedding is zero.
    onehot = jnp.where((iota == ids) & (ids > 0), 1.0, 0.0).astype(jnp.bfloat16)

    # Fused embedding "gather" as an MXU matmul: (B*S, V) @ (V, H).
    emb = jnp.dot(onehot, emb_tbl_ref[...],
                  preferred_element_type=jnp.float32)             # (B*S, H) f32

    # TODO(synk): single tanh(Linear) layer stands in for the pretrained
    # kobigbird-bert-base encoder (no clean Pallas equivalent of a checkpoint).
    h = jnp.tanh(
        jnp.dot(emb.astype(jnp.bfloat16), w_enc_ref[...],
                preferred_element_type=jnp.float32)
        + b_enc_ref[...]
    )                                                             # (B*S, H) f32

    # qa_outputs computed transposed: (C_PAD, B*S) = w_qa^T @ h^T, so the result
    # is lane-dense (tokens on lanes).  Bias omitted (cancels under softmax).
    # h kept in f32: the matmul is tiny (8 x 256 x 128) and this avoids a
    # bf16 repack while tightening accuracy.
    logits_t = lax.dot_general(
        w_qa_t_ref[...], h,
        dimension_numbers=(((1,), (1,)), ((), ())),
        preferred_element_type=jnp.float32,
    )                                                             # (C_PAD, B*S)

    # Per-batch softmax over the sequence (lane) axis; matches
    # torch.Softmax(dim=-1) applied to the squeezed (B, S) start/end logits.
    for b in range(B):  # B is tiny & static -> unrolled at trace time
        lg = logits_t[:, b * S:(b + 1) * S]                       # (C_PAD, S)
        m = jnp.max(lg, axis=-1, keepdims=True)
        e = jnp.exp(lg - m)
        inv = pl.reciprocal(jnp.sum(e, axis=-1, keepdims=True), approx=True)
        out_ref[b] = (e * inv).astype(out_ref.dtype)              # (C_PAD, S) store


def prepare_params(params):
    """One-time weight prep (hoisted off the per-call critical path)."""
    emb_table, w_enc, b_enc, w_qa, b_qa = params
    del b_qa  # constant along the softmax axis -> cancels; dropped at inference
    emb_tbl_bf = emb_table.astype(jnp.bfloat16)                   # (V, H)
    w_enc_bf = w_enc.astype(jnp.bfloat16)                         # (H, H)
    # qa weight transposed and zero-padded 2 -> 8 channels so the stored tile is
    # a whole (8, 128) vreg; extra channels yield a harmless uniform softmax.
    w_qa_t = jnp.zeros((C_PAD, H), jnp.float32).at[:2, :].set(
        w_qa.T.astype(jnp.float32))
    b_enc_f32 = b_enc.astype(jnp.float32)
    return emb_tbl_bf, w_enc_bf, b_enc_f32, w_qa_t


def _forward(input_ids, emb_tbl_bf, w_enc_bf, b_enc, w_qa_t):
    """Inference branch of QuestionAnswering.forward (start/end softmax probs)."""
    ids = input_ids.reshape(B * S, 1).astype(jnp.int32)

    vmem = pl.BlockSpec(memory_space=pltpu.MemorySpace.VMEM)
    out = pl.pallas_call(
        qa_kernel,
        out_shape=jax.ShapeDtypeStruct((B, C_PAD, S), jnp.float32),
        in_specs=[vmem, vmem, vmem, vmem, vmem],  # grid-less: whole arrays in VMEM
        out_specs=vmem,
    )(ids, emb_tbl_bf, w_enc_bf, b_enc, w_qa_t)

    start_probs = out[:, 0, :]   # logits.split(1, dim=-1)[0].squeeze(-1) -> softmax
    end_probs = out[:, 1, :]
    return start_probs, end_probs
    # TODO(synk): training branch (CrossEntropyLoss with ignore_index/clamp)
    # not implemented; only the inference (softmax) branch is kernelized.


question_answering_forward = jax.jit(_forward)


def reference_forward(input_ids, params):
    emb_table, w_enc, b_enc, w_qa, b_qa = params
    mask = (input_ids > 0).astype(jnp.float32)[..., None]
    emb = emb_table[input_ids] * mask
    h = jnp.tanh(emb @ w_enc + b_enc)
    logits = h @ w_qa + b_qa
    start = jax.nn.softmax(logits[..., 0], axis=-1)
    end = jax.nn.softmax(logits[..., 1], axis=-1)
    return start, end


if __name__ == "__main__":
    key = jax.random.PRNGKey(0)
    k1, k2, k3, k4, k5, k6 = jax.random.split(key, 6)

    # Deterministic synthetic parameters (shapes follow the module's __init__,
    # scaled down: hidden 768 -> 128).
    emb_table = jax.random.normal(k1, (V, H), jnp.float32) * 0.02
    w_enc = jax.random.normal(k2, (H, H), jnp.float32) / math.sqrt(H)
    b_enc = jax.random.normal(k3, (1, H), jnp.float32) * 0.01
    w_qa = jax.random.normal(k4, (H, 2), jnp.float32) / math.sqrt(H)
    b_qa = jax.random.normal(k5, (1, 2), jnp.float32) * 0.01
    params = (emb_table, w_enc, b_enc, w_qa, b_qa)

    # One-time weight preparation (outside the per-call critical path).
    prepped = prepare_params(params)

    # input_ids with some trailing padding (id 0) so attention_mask matters.
    input_ids = jax.random.randint(k6, (B, S), 0, V, dtype=jnp.int32)
    input_ids = input_ids.at[:, S - 16:].set(0)

    start_p, end_p = question_answering_forward(input_ids, *prepped)
    jax.block_until_ready((start_p, end_p))

    ref_start, ref_end = reference_forward(input_ids, params)
    np.testing.assert_allclose(np.asarray(start_p), np.asarray(ref_start),
                               rtol=5e-2, atol=5e-3)
    np.testing.assert_allclose(np.asarray(end_p), np.asarray(ref_end),
                               rtol=5e-2, atol=5e-3)
    assert start_p.shape == (B, S) and end_p.shape == (B, S)

    print("KERNEL_OK")
</pallas_src>

<mosaic_0001>
module attributes {stable_mosaic.version = 11 : i64} {
  func.func @qa_kernel(%arg0: memref<256x1xi32, #tpu.memory_space<vmem>>, %arg1: memref<32x128xbf16, #tpu.memory_space<vmem>>, %arg2: memref<128x128xbf16, #tpu.memory_space<vmem>>, %arg3: memref<1x128xf32, #tpu.memory_space<vmem>>, %arg4: memref<8x128xf32, #tpu.memory_space<vmem>>, %arg5: memref<2x8x128xf32, #tpu.memory_space<vmem>>) attributes {dimension_semantics = [], scalar_prefetch = 0 : i64, scratch_operands = 0 : i64, tpu.core_type = #tpu.core_type<tc>} {
    %c0 = arith.constant 0 : index
    %c0_0 = arith.constant 0 : index
    %0 = vector.load %arg0[%c0, %c0_0] : memref<256x1xi32, #tpu.memory_space<vmem>>, vector<256x1xi32>
    %1 = tpu.iota {dimensions = array<i32: 1>} : vector<256x32xi32>
    %2 = vector.broadcast %0 : vector<256x1xi32> to vector<256x32xi32>
    %3 = arith.cmpi eq, %1, %2 : vector<256x32xi32>
    %c0_i32 = arith.constant 0 : i32
    %4 = vector.broadcast %c0_i32 : i32 to vector<256x1xi32>
    %5 = arith.cmpi sgt, %0, %4 : vector<256x1xi32>
    %6 = vector.broadcast %5 : vector<256x1xi1> to vector<256x32xi1>
    %7 = arith.andi %3, %6 : vector<256x32xi1>
    %cst = arith.constant 1.000000e+00 : f32
    %cst_1 = arith.constant 0.000000e+00 : f32
    %8 = vector.broadcast %cst : f32 to vector<256x32xf32>
    %9 = vector.broadcast %cst_1 : f32 to vector<256x32xf32>
    %10 = arith.select %7, %8, %9 : vector<256x32xi1>, vector<256x32xf32>
    %11 = arith.truncf %10 : vector<256x32xf32> to vector<256x32xbf16>
    %c0_2 = arith.constant 0 : index
    %c0_3 = arith.constant 0 : index
    %12 = vector.load %arg1[%c0_2, %c0_3] : memref<32x128xbf16, #tpu.memory_space<vmem>>, vector<32x128xbf16>
    %cst_4 = arith.constant dense<0.000000e+00> : vector<256x128xf32>
    %13 = tpu.matmul %11, %12, %cst_4 {dimension_numbers = #tpu.dot_dimension_numbers<[1], [0], [0], [1], [0, 0, 1, 1], [], []>} : vector<256x32xbf16>, vector<32x128xbf16>, vector<256x128xf32> -> vector<256x128xf32>
    %14 = arith.truncf %13 : vector<256x128xf32> to vector<256x128xbf16>
    %c0_5 = arith.constant 0 : index
    %c0_6 = arith.constant 0 : index
    %15 = vector.load %arg2[%c0_5, %c0_6] : memref<128x128xbf16, #tpu.memory_space<vmem>>, vector<128x128xbf16>
    %cst_7 = arith.constant dense<0.000000e+00> : vector<256x128xf32>
    %16 = tpu.matmul %14, %15, %cst_7 {dimension_numbers = #tpu.dot_dimension_numbers<[1], [0], [0], [1], [0, 0, 1, 1], [], []>} : vector<256x128xbf16>, vector<128x128xbf16>, vector<256x128xf32> -> vector<256x128xf32>
    %c0_8 = arith.constant 0 : index
    %c0_9 = arith.constant 0 : index
    %17 = vector.load %arg3[%c0_8, %c0_9] : memref<1x128xf32, #tpu.memory_space<vmem>>, vector<1x128xf32>
    %18 = vector.broadcast %17 : vector<1x128xf32> to vector<256x128xf32>
    %19 = arith.addf %16, %18 : vector<256x128xf32>
    %20 = math.tanh %19 : vector<256x128xf32>
    %c0_10 = arith.constant 0 : index
    %c0_11 = arith.constant 0 : index
    %21 = vector.load %arg4[%c0_10, %c0_11] : memref<8x128xf32, #tpu.memory_space<vmem>>, vector<8x128xf32>
    %cst_12 = arith.constant dense<0.000000e+00> : vector<8x256xf32>
    %22 = tpu.matmul %21, %20, %cst_12 {dimension_numbers = #tpu.dot_dimension_numbers<[1], [1], [0], [0], [0, 0, 1, 0], [], []>} : vector<8x128xf32>, vector<256x128xf32>, vector<8x256xf32> -> vector<8x256xf32>
    %23 = vector.extract_strided_slice %22 {offsets = [0, 0], sizes = [8, 128], strides = [1, 1]} : vector<8x256xf32> to vector<8x128xf32>
    %cst_13 = arith.constant dense<0xFF800000> : vector<8xf32>
    %24 = vector.multi_reduction <maximumf>, %23, %cst_13 [1] : vector<8x128xf32> to vector<8xf32>
    %25 = vector.shape_cast %24 : vector<8xf32> to vector<8x1xf32>
    %26 = vector.broadcast %25 : vector<8x1xf32> to vector<8x128xf32>
    %27 = arith.subf %23, %26 : vector<8x128xf32>
    %28 = math.exp %27 : vector<8x128xf32>
    %cst_14 = arith.constant dense<0.000000e+00> : vector<8xf32>
    %29 = vector.multi_reduction <add>, %28, %cst_14 [1] : vector<8x128xf32> to vector<8xf32>
    %30 = vector.shape_cast %29 : vector<8xf32> to vector<8x1xf32>
    %31 = tpu.reciprocal %30 {approx = true} : vector<8x1xf32> -> vector<8x1xf32>
    %32 = vector.broadcast %31 : vector<8x1xf32> to vector<8x128xf32>
    %33 = arith.mulf %28, %32 : vector<8x128xf32>
    %c0_15 = arith.constant 0 : index
    %c0_16 = arith.constant 0 : index
    %c0_17 = arith.constant 0 : index
    %34 = vector.load %arg5[%c0_15, %c0_16, %c0_17] : memref<2x8x128xf32, #tpu.memory_space<vmem>>, vector<1x8x128xf32>
    %35 = vector.shape_cast %34 : vector<1x8x128xf32> to vector<8x128xf32>
    %36 = vector.shape_cast %33 : vector<8x128xf32> to vector<1x8x128xf32>
    tpu.vector_store %arg5[%c0_15, %c0_16, %c0_17], %36 {strides = array<i32>} : memref<2x8x128xf32, #tpu.memory_space<vmem>>, vector<1x8x128xf32>,
    %37 = vector.extract_strided_slice %22 {offsets = [0, 128], sizes = [8, 128], strides = [1, 1]} : vector<8x256xf32> to vector<8x128xf32>
    %cst_18 = arith.constant dense<0xFF800000> : vector<8xf32>
    %38 = vector.multi_reduction <maximumf>, %37, %cst_18 [1] : vector<8x128xf32> to vector<8xf32>
    %39 = vector.shape_cast %38 : vector<8xf32> to vector<8x1xf32>
    %40 = vector.broadcast %39 : vector<8x1xf32> to vector<8x128xf32>
    %41 = arith.subf %37, %40 : vector<8x128xf32>
    %42 = math.exp %41 : vector<8x128xf32>
    %cst_19 = arith.constant dense<0.000000e+00> : vector<8xf32>
    %43 = vector.multi_reduction <add>, %42, %cst_19 [1] : vector<8x128xf32> to vector<8xf32>
    %44 = vector.shape_cast %43 : vector<8xf32> to vector<8x1xf32>
    %45 = tpu.reciprocal %44 {approx = true} : vector<8x1xf32> -> vector<8x1xf32>
    %46 = vector.broadcast %45 : vector<8x1xf32> to vector<8x128xf32>
    %47 = arith.mulf %42, %46 : vector<8x128xf32>
    %c1 = arith.constant 1 : index
    %c0_20 = arith.constant 0 : index
    %c0_21 = arith.constant 0 : index
    %48 = vector.load %arg5[%c1, %c0_20, %c0_21] : memref<2x8x128xf32, #tpu.memory_space<vmem>>, vector<1x8x128xf32>
    %49 = vector.shape_cast %48 : vector<1x8x128xf32> to vector<8x128xf32>
    %50 = vector.shape_cast %47 : vector<8x128xf32> to vector<1x8x128xf32>
    tpu.vector_store %arg5[%c1, %c0_20, %c0_21], %50 {strides = array<i32>} : memref<2x8x128xf32, #tpu.memory_space<vmem>>, vector<1x8x128xf32>,
    return
  }
}

</mosaic_0001>

<bundles_post_ra>
// kernel: _forward.1
= control target key start
LH: loop header
LB: loop body
LE: loop exit
PB: predicated region body
PF: predicated region fallthrough
CT: control target
= control target key end

     0   :  { %v1364_v0 = vmov 0   ;;  %s1878_s0 = inlined_call_operand.vmem [shape: s32[256,1], index: 0, kind: input, shape index: {}]   ;;  %s1879_s1 = inlined_call_operand.vmem [shape: bf16[32,128], index: 1, kind: input, shape index: {}]   ;;  %s1880_s2 = inlined_call_operand.vmem [shape: bf16[128,128], index: 2, kind: input, shape index: {}]   ;;  %s1881_s3 = inlined_call_operand.vmem [shape: f32[1,128], index: 3, kind: input, shape index: {}]   ;;  %s1882_s4 = inlined_call_operand.vmem [shape: f32[8,128], index: 4, kind: input, shape index: {}]   ;;  %s1883_s5 = inlined_call_operand.vmem [shape: f32[2,8,128], index: 5, kind: output, shape index: {}]  }
   0x1   :  { %1280 = vset.pattern.permute.xlu0 %v1364_v0  ;;  %v21_v1 = vld [vmem:[%s1878_s0] sm:$0xff]  ;;  %1281 = vset.pattern.permute.xlu1 %v1364_v0  ;;  %v22_v2 = vld [vmem:[%s1878_s0 + $0x8] sm:$0xff]  ;;  %v23_v5 = vld [vmem:[%s1878_s0 + $0x10] sm:$0xff] }
   0x2   :  { %56 = vperm.xlu0 %1280, %v21_v1   ;;  %vm183_vm0 = vcmp.gt.s32.totalorder %v21_v1, 0  ;;  %vm184_vm1 = vcmp.gt.s32.totalorder %v22_v2, 0  ;;  %v24_v6 = vld [vmem:[%s1878_s0 + $0x18] sm:$0xff]  ;;  %vm185_vm2 = vcmp.gt.s32.totalorder %v23_v5, 0  ;;  %v1415_v7 = vld [vmem:[%s1878_s0 + $0x20] sm:$0xff]  ;;  %v1428_v11 = vld [vmem:[%s1878_s0 + $0x88] sm:$0xff] }
   0x3   :  { %v215_v3 = vsel %vm183_vm0, 1, %v1364_v0  ;;  %v216_v4 = vsel %vm184_vm1, 1, %v1364_v0  ;;  %vm186_vm3 = vcmp.gt.s32.totalorder %v24_v6, 0  ;;  %v217_v8 = vsel %vm185_vm2, 1, %v1364_v0  ;;  %v1423_v10 = vld [vmem:[%s1878_s0 + $0x80] sm:$0xff]  ;;  %v1433_v12 = vld [vmem:[%s1878_s0 + $0x90] sm:$0xff] }
   0x4   :  { %248 = vperm.xlu1 %1281, %v215_v3   ;;  %v218_v9 = vsel %vm186_vm3, 1, %v1364_v0  ;;  %vm187_vm4 = vcmp.gt.s32.totalorder %v1415_v7, 0  ;;  %vm199_vm5 = vcmp.gt.s32.totalorder %v1423_v10, 0  ;;  %vm200_vm6 = vcmp.gt.s32.totalorder %v1428_v11, 0  ;;  %v1440_v13 = vld [vmem:[%s1878_s0 + $0x98] sm:$0xff]  ;;  %v1446_v14 = vld [vmem:[%s1878_s0 + $0xa0] sm:$0xff] }
   0x5   :  { %vm201_vm7 = vcmp.gt.s32.totalorder %v1433_v12, 0  ;;  %v1451_v15 = vld [vmem:[%s1878_s0 + $0xa8] sm:$0xff]  ;;  %v1454_v16 = vsel %vm199_vm5, 1, %v1364_v0  ;;  %v1457_v17 = vsel %vm200_vm6, 1, %v1364_v0  ;;  %vm202_vm8 = vcmp.gt.s32.totalorder %v1440_v13, 0  ;;  %v1466_v19 = vld [vmem:[%s1878_s0 + $0xb0] sm:$0xff] }
   0x6   :  { %59 = vperm.xlu0 %1280, %v22_v2   ;;  %v1460_v18 = vsel %vm201_vm7, 1, %v1364_v0  ;;  %v1471_v20 = vld [vmem:[%s1878_s0 + $0xb8] sm:$0xff]  ;;  %v1474_v21 = vsel %vm202_vm8, 1, %v1364_v0  ;;  %vm203_vm9 = vcmp.gt.s32.totalorder %v1446_v14, 0  ;;  %vm204_vm10 = vcmp.gt.s32.totalorder %v1451_v15, 0  ;;  %v1482_v22 = vld [vmem:[%s1878_s0 + $0xc0] sm:$0xff] }
   0x7   :  { %vm205_vm11 = vcmp.gt.s32.totalorder %v1466_v19, 0  ;;  %v1487_v23 = vld [vmem:[%s1878_s0 + $0xc8] sm:$0xff]  ;;  %v1490_v24 = vsel %vm203_vm9, 1, %v1364_v0  ;;  %v1493_v25 = vsel %vm204_vm10, 1, %v1364_v0  ;;  %vm206_vm12 = vcmp.gt.s32.totalorder %v1471_v20, 0  ;;  %v1502_v27 = vld [vmem:[%s1878_s0 + $0xd0] sm:$0xff] }
   0x8   :  { %251 = vperm.xlu1 %1281, %v216_v4   ;;  %v1496_v26 = vsel %vm205_vm11, 1, %v1364_v0  ;;  %v1507_v28 = vld [vmem:[%s1878_s0 + $0xd8] sm:$0xff]  ;;  %v1510_v29 = vsel %vm206_vm12, 1, %v1364_v0  ;;  %vm207_vm13 = vcmp.gt.s32.totalorder %v1482_v22, 0  ;;  %vm208_vm14 = vcmp.gt.s32.totalorder %v1487_v23, 0  ;;  %v1518_v30 = vld [vmem:[%s1878_s0 + $0xe0] sm:$0xff] }
   0x9   :  { %vm209_vm15 = vcmp.gt.s32.totalorder %v1502_v27, 0  ;;  %v1523_v31 = vld [vmem:[%s1878_s0 + $0xe8] sm:$0xff]  ;;  %v1529_v33 = vsel %vm207_vm13, 1, %v1364_v0  ;;  %v1532_v34 = vsel %vm208_vm14, 1, %v1364_v0  ;;  %vm210_vm0 = vcmp.gt.s32.totalorder %v1507_v28, 0  ;;  %v1541_v36 = vld [vmem:[%s1878_s0 + $0xf0] sm:$0xff] }
   0xa   :  { %62 = vperm.xlu0 %1280, %v23_v5   ;;  %v26_v32 = vld [vmem:[%s1878_s0 + $0x28] sm:$0xff]  ;;  %v1535_v35 = vsel %vm209_vm15, 1, %v1364_v0  ;;  %v1546_v37 = vld [vmem:[%s1878_s0 + $0xf8] sm:$0xff]  ;;  %v1549_v38 = vsel %vm210_vm0, 1, %v1364_v0  ;;  %vm211_vm1 = vcmp.gt.s32.totalorder %v1518_v30, 0  ;;  %vm212_vm2 = vcmp.gt.s32.totalorder %v1523_v31, 0 }
   0xb   :  { %vm213_vm3 = vcmp.gt.s32.totalorder %v1541_v36, 0  ;;  %v1555_v39 = vsel %vm211_vm1, 1, %v1364_v0  ;;  %v1558_v40 = vsel %vm212_vm2, 1, %v1364_v0  ;;  %vm214_vm5 = vcmp.gt.s32.totalorder %v1546_v37, 0  ;;  %v1282_v43 = vld [vmem:[%s1879_s1] sm:$0xff]   ;;  %v1283_v44 = vld [vmem:[%s1879_s1 + $0x8] sm:$0xff]  }
   0xc   :  { %65 = vperm.xlu1 %1281, %v24_v6   ;;  %v1561_v41 = vsel %vm213_vm3, 1, %v1364_v0  ;;  %vm188_vm6 = vcmp.gt.s32.totalorder %v26_v32, 0  ;;  %v1566_v42 = vsel %vm214_vm5, 1, %v1364_v0  ;;  %v219_v45 = vsel %vm187_vm4, 1, %v1364_v0  ;;  %1162 = vmatprep.subr.bf16.mxu0 %v1282_v43  ;;  %v27_v47 = vld [vmem:[%s1878_s0 + $0x30] sm:$0xff]  ;;  %v28_v48 = vld [vmem:[%s1878_s0 + $0x38] sm:$0xff] }
   0xd   :  { %v220_v46 = vsel %vm188_vm6, 1, %v1364_v0  ;;  %1163 = vmatpush3.bf16.msra.mxu0 %v1282_v43  ;;  %vm189_vm7 = vcmp.gt.s32.totalorder %v27_v47, 0  ;;  %vm190_vm4 = vcmp.gt.s32.totalorder %v28_v48, 0  ;;  %v29_v51 = vld [vmem:[%s1878_s0 + $0x40] sm:$0xff]  ;;  %v30_v52 = vld [vmem:[%s1878_s0 + $0x48] sm:$0xff]  ;;  %v31_v55 = vld [vmem:[%s1878_s0 + $0x50] sm:$0xff] }
   0xe   :  { %254 = vperm.xlu0 %1280, %v217_v8   ;;  %1164 = vmatprep.subr.bf16.mxu0 %v1283_v44  ;;  %v221_v49 = vsel %vm189_vm7, 1, %v1364_v0  ;;  %v222_v50 = vsel %vm190_vm4, 1, %v1364_v0  ;;  %vm191_vm8 = vcmp.gt.s32.totalorder %v29_v51, 0  ;;  %vm192_vm9 = vcmp.gt.s32.totalorder %v30_v52, 0  ;;  %v32_v56 = vld [vmem:[%s1878_s0 + $0x58] sm:$0xff]  ;;  %v33_v59 = vld [vmem:[%s1878_s0 + $0x60] sm:$0xff] }
   0xf   :  { %v223_v53 = vsel %vm191_vm8, 1, %v1364_v0  ;;  %v224_v54 = vsel %vm192_vm9, 1, %v1364_v0  ;;  %vm193_vm10 = vcmp.gt.s32.totalorder %v31_v55, 0  ;;  %vm194_vm11 = vcmp.gt.s32.totalorder %v32_v56, 0  ;;  %v34_v60 = vld [vmem:[%s1878_s0 + $0x68] sm:$0xff]  ;;  %v35_v63 = vld [vmem:[%s1878_s0 + $0x70] sm:$0xff] }
  0x10   :  { %257 = vperm.xlu1 %1281, %v218_v9   ;;  %v225_v57 = vsel %vm193_vm10, 1, %v1364_v0  ;;  %v226_v58 = vsel %vm194_vm11, 1, %v1364_v0  ;;  %vm195_vm12 = vcmp.gt.s32.totalorder %v33_v59, 0  ;;  %vm196_vm13 = vcmp.gt.s32.totalorder %v34_v60, 0  ;;  %v36_v1 = vld [vmem:[%s1878_s0 + $0x78] sm:$0xff]  ;;  %v1284_v8 = vld [vmem:[%s1880_s2] sm:$0xff]  }
  0x11   :  { %1165 = vmatpush3.bf16.msra.mxu0 %v1283_v44  ;;  %v227_v61 = vsel %vm195_vm12, 1, %v1364_v0  ;;  %v228_v62 = vsel %vm196_vm13, 1, %v1364_v0  ;;  %vm197_vm14 = vcmp.gt.s32.totalorder %v35_v63, 0  ;;  %vm198_vm15 = vcmp.gt.s32.totalorder %v36_v1, 0  ;;  %1198 = vmatprep.subr.bf16.mxu1 %v1284_v8 }
  0x12   :  { %68 = vperm.xlu0 %1280, %v1415_v7   ;;  %v229_v2 = vsel %vm197_vm14, 1, %v1364_v0  ;;  %v230_v3 = vsel %vm198_vm15, 1, %v1364_v0  ;;  %v53_v0 = vlaneseq  ;;  %vm471_vm7 = vcmask 261120   ;;  %1199 = vmatpush3.bf16.msra.mxu1 %v1284_v8 }
  0x14   :  { %71 = vperm.xlu1 %1281, %v26_v32   ;;  %v1649_v4 = vand.u32 127, %v53_v0 }
  0x16   :  { %260 = vperm.xlu0 %1280, %v219_v45  }
  0x18   :  { %263 = vperm.xlu1 %1281, %v220_v46  }
  0x1a   :  { %74 = vperm.xlu0 %1280, %v27_v47  }
  0x1c   :  { %77 = vperm.xlu1 %1281, %v28_v48  }
  0x1e   :  { %266 = vperm.xlu0 %1280, %v221_v49  }
  0x20   :  { %269 = vperm.xlu1 %1281, %v222_v50  }
  0x22   :  { %80 = vperm.xlu0 %1280, %v29_v51  }
  0x24   :  { %83 = vperm.xlu1 %1281, %v30_v52  }
  0x26   :  { %272 = vperm.xlu0 %1280, %v223_v53  }
  0x28   :  { %275 = vperm.xlu1 %1281, %v224_v54  }
  0x2a   :  { %86 = vperm.xlu0 %1280, %v31_v55  }
  0x2c   :  { %89 = vperm.xlu1 %1281, %v32_v56  }
  0x2e   :  { %278 = vperm.xlu0 %1280, %v225_v57  }
  0x30   :  { %281 = vperm.xlu1 %1281, %v226_v58  }
  0x32   :  { %92 = vperm.xlu0 %1280, %v33_v59  }
  0x34   :  { %95 = vperm.xlu1 %1281, %v34_v60  }
  0x36   :  { %284 = vperm.xlu0 %1280, %v227_v61  }
  0x38   :  { %287 = vperm.xlu1 %1281, %v228_v62  }
  0x3a   :  { %98 = vperm.xlu0 %1280, %v35_v63  }
  0x3c   :  { %101 = vperm.xlu1 %1281, %v36_v1  }
  0x3e   :  { %290 = vperm.xlu0 %1280, %v229_v2  }
  0x40   :  { %293 = vperm.xlu1 %1281, %v230_v3  }
  0x42   :  { %104 = vperm.xlu0 %1280, %v1423_v10   ;;  %v1285_v10 = vld [vmem:[%s1880_s2 + $0x8] sm:$0xff]  }
  0x43   :  { %1200 = vmatprep.subr.bf16.mxu1 %v1285_v10 }
  0x44   :  { %107 = vperm.xlu1 %1281, %v1428_v11   ;;  %1201 = vmatpush3.bf16.msra.mxu1 %v1285_v10 }
  0x46   :  { %296 = vperm.xlu0 %1280, %v1454_v16  }
  0x48   :  { %299 = vperm.xlu1 %1281, %v1457_v17  }
  0x4a   :  { %110 = vperm.xlu0 %1280, %v1433_v12   ;;  %v1365_v12 = vmov 0.0  }
  0x4c   :  { %113 = vperm.xlu1 %1281, %v1440_v13  }
  0x4e   :  { %302 = vperm.xlu0 %1280, %v1460_v18  }
  0x50   :  { %305 = vperm.xlu1 %1281, %v1474_v21  }
  0x52   :  { %116 = vperm.xlu0 %1280, %v1446_v14  }
  0x54   :  { %119 = vperm.xlu1 %1281, %v1451_v15   ;;  %v1286_v15 = vld [vmem:[%s1880_s2 + $0x10] sm:$0xff]  }
  0x55   :  { %1202 = vmatprep.subr.bf16.mxu1 %v1286_v15 }
  0x56   :  { %308 = vperm.xlu0 %1280, %v1490_v24   ;;  %1203 = vmatpush3.bf16.msra.mxu1 %v1286_v15  ;;  %v1288_v24 = vld [vmem:[%s1880_s2 + $0x20] sm:$0xff]  }
  0x58   :  { %311 = vperm.xlu1 %1281, %v1493_v25  }
  0x5a   :  { %122 = vperm.xlu0 %1280, %v1466_v19   ;;  %v1287_v19 = vld [vmem:[%s1880_s2 + $0x18] sm:$0xff]  }
  0x5b   :  { %1204 = vmatprep.subr.bf16.mxu1 %v1287_v19 }
  0x5c   :  { %125 = vperm.xlu1 %1281, %v1471_v20   ;;  %1205 = vmatpush3.bf16.msra.mxu1 %v1287_v19 }
  0x5d   :  { %1206 = vmatprep.subr.bf16.mxu1 %v1288_v24 }
  0x5e   :  { %314 = vperm.xlu0 %1280, %v1496_v26  }
  0x60   :  { %317 = vperm.xlu1 %1281, %v1510_v29   ;;  %1207 = vmatpush3.bf16.msra.mxu1 %v1288_v24 }
  0x62   :  { %128 = vperm.xlu0 %1280, %v1482_v22  }
  0x64   :  { %131 = vperm.xlu1 %1281, %v1487_v23  }
  0x66   :  { %320 = vperm.xlu0 %1280, %v1529_v33   ;;  %v1290_v33 = vld [vmem:[%s1880_s2 + $0x30] sm:$0xff]  }
  0x68   :  { %323 = vperm.xlu1 %1281, %v1532_v34  }
  0x6a   :  { %134 = vperm.xlu0 %1280, %v1502_v27  }
  0x6c   :  { %137 = vperm.xlu1 %1281, %v1507_v28   ;;  %v1289_v28 = vld [vmem:[%s1880_s2 + $0x28] sm:$0xff]  }
  0x6d   :  { %1208 = vmatprep.subr.bf16.mxu1 %v1289_v28 }
  0x6e   :  { %326 = vperm.xlu0 %1280, %v1535_v35   ;;  %1209 = vmatpush3.bf16.msra.mxu1 %v1289_v28 }
  0x6f   :  { %1210 = vmatprep.subr.bf16.mxu1 %v1290_v33 }
  0x70   :  { %329 = vperm.xlu1 %1281, %v1549_v38  }
  0x72   :  { %140 = vperm.xlu0 %1280, %v1518_v30   ;;  %1211 = vmatpush3.bf16.msra.mxu1 %v1290_v33 }
  0x74   :  { %143 = vperm.xlu1 %1281, %v1523_v31  }
  0x76   :  { %332 = vperm.xlu0 %1280, %v1555_v39  }
  0x78   :  { %335 = vperm.xlu1 %1281, %v1558_v40  }
  0x7a   :  { %146 = vperm.xlu0 %1280, %v1541_v36  }
  0x7c   :  { %149 = vperm.xlu1 %1281, %v1546_v37  }
  0x7e   :  { %338 = vperm.xlu0 %1280, %v1561_v41  }
  0x80   :  { %341 = vperm.xlu1 %1281, %v1566_v42  }
  0x81   :  { %v57_v5 = vpop.permute.xlu0 %56 }
  0x82   :  { %vm151_vm0 = vcmp.eq.s32.totalorder %v1649_v4, %v57_v5 }
  0x83   :  { %v249_v6 = vpop.permute.xlu1 %248 }
  0x84   :  { %vm343_vm1 = vcmp.eq.s32.totalorder %v249_v6, 1 }
  0x85   :  { %vm375_vm2 = vmand %vm151_vm0, %vm343_vm1  ;;  %v60_v7 = vpop.permute.xlu0 %59 }
  0x86   :  { %vm152_vm3 = vcmp.eq.s32.totalorder %v1649_v4, %v60_v7  ;;  %v407_v13 = vsel %vm375_vm2, 1.0, %v1365_v12 }
  0x87   :  { %v252_v9 = vpop.permute.xlu1 %251 }
  0x88   :  { %vm344_vm5 = vcmp.eq.s32.totalorder %v252_v9, 1 }
  0x89   :  { %vm376_vm6 = vmand %vm152_vm3, %vm344_vm5  ;;  %v63_v11 = vpop.permute.xlu0 %62 }
  0x8a   :  { %v408_v14 = vsel %vm376_vm6, 1.0, %v1365_v12  ;;  %vm153_vm4 = vcmp.eq.s32.totalorder %v1649_v4, %v63_v11 }
  0x8b   :  { %v66_v16 = vpop.permute.xlu1 %65  ;;  %v439_v17 = vpack.c.bf16 %v408_v14, %v407_v13 }
  0x8c   :  { %vm154_vm10 = vcmp.eq.s32.totalorder %v1649_v4, %v66_v16 }
  0x8d   :  { %v255_v18 = vpop.permute.xlu0 %254  ;;  %1166 = vmatprep.mubr.msk.bf16.mxu0 %vm471_vm7, %v439_v17 }
  0x8e   :  { %vm345_vm8 = vcmp.eq.s32.totalorder %v255_v18, 1 }
  0x8f   :  { %vm377_vm9 = vmand %vm153_vm4, %vm345_vm8  ;;  %v258_v20 = vpop.permute.xlu1 %257 }
  0x90   :  { %vm346_vm11 = vcmp.eq.s32.totalorder %v258_v20, 1  ;;  %v409_v22 = vsel %vm377_vm9, 1.0, %v1365_v12 }
  0x91   :  { %vm378_vm12 = vmand %vm154_vm10, %vm346_vm11  ;;  %v69_v21 = vpop.permute.xlu0 %68 }
  0x92   :  { %v410_v23 = vsel %vm378_vm12, 1.0, %v1365_v12  ;;  %vm155_vm13 = vcmp.eq.s32.totalorder %v1649_v4, %v69_v21 }
  0x93   :  { %v440_v25 = vpack.c.bf16 %v410_v23, %v409_v22  ;;  %v72_v26 = vpop.permute.xlu1 %71 }
  0x94   :  { %vm156_vm0 = vcmp.eq.s32.totalorder %v1649_v4, %v72_v26 }
  0x95   :  { %v261_v27 = vpop.permute.xlu0 %260  ;;  %1167 = vmatmul.mubr.msk.bf16.vlgmr.msra.gmra.mrb[0].mxu0 %vm471_vm7, %v440_v25 }
  0x96   :  { %vm347_vm14 = vcmp.eq.s32.totalorder %v261_v27, 1 }
  0x97   :  { %vm379_vm15 = vmand %vm155_vm13, %vm347_vm14  ;;  %v264_v29 = vpop.permute.xlu1 %263 }
  0x98   :  { %vm348_vm1 = vcmp.eq.s32.totalorder %v264_v29, 1  ;;  %v411_v31 = vsel %vm379_vm15, 1.0, %v1365_v12 }
  0x99   :  { %vm380_vm2 = vmand %vm156_vm0, %vm348_vm1  ;;  %v75_v30 = vpop.permute.xlu0 %74 }
  0x9a   :  { %v412_v32 = vsel %vm380_vm2, 1.0, %v1365_v12  ;;  %vm157_vm3 = vcmp.eq.s32.totalorder %v1649_v4, %v75_v30 }
  0x9b   :  { %v441_v34 = vpack.c.bf16 %v412_v32, %v411_v31  ;;  %v78_v35 = vpop.permute.xlu1 %77 }
  0x9c   :  { %vm158_vm4 = vcmp.eq.s32.totalorder %v1649_v4, %v78_v35 }
  0x9d   :  { %v267_v36 = vpop.permute.xlu0 %266  ;;  %1170 = vmatprep.mubr.msk.bf16.mxu0 %vm471_vm7, %v441_v34 }
  0x9e   :  { %vm349_vm5 = vcmp.eq.s32.totalorder %v267_v36, 1 }
  0x9f   :  { %vm381_vm6 = vmand %vm157_vm3, %vm349_vm5  ;;  %v270_v37 = vpop.permute.xlu1 %269 }
  0xa0   :  { %vm350_vm8 = vcmp.eq.s32.totalorder %v270_v37, 1  ;;  %v413_v39 = vsel %vm381_vm6, 1.0, %v1365_v12 }
  0xa1   :  { %vm382_vm9 = vmand %vm158_vm4, %vm350_vm8  ;;  %v81_v38 = vpop.permute.xlu0 %80 }
  0xa2   :  { %v414_v40 = vsel %vm382_vm9, 1.0, %v1365_v12  ;;  %vm159_vm10 = vcmp.eq.s32.totalorder %v1649_v4, %v81_v38 }
  0xa3   :  { %v442_v41 = vpack.c.bf16 %v414_v40, %v413_v39  ;;  %v84_v42 = vpop.permute.xlu1 %83  ;;  %v1291_v40 = vld [vmem:[%s1880_s2 + $0x38] sm:$0xff]  }
  0xa4   :  { %vm160_vm13 = vcmp.eq.s32.totalorder %v1649_v4, %v84_v42  ;;  %1212 = vmatprep.subr.bf16.mxu1 %v1291_v40 }
  0xa5   :  { %v273_v43 = vpop.permute.xlu0 %272  ;;  %1171 = vmatmul.mubr.msk.bf16.gmra.mrb[4].mxu0 %vm471_vm7, %v442_v41  ;;  %1213 = vmatpush3.bf16.msra.mxu1 %v1291_v40 }
  0xa6   :  { %vm351_vm11 = vcmp.eq.s32.totalorder %v273_v43, 1 }
  0xa7   :  { %vm383_vm12 = vmand %vm159_vm10, %vm351_vm11  ;;  %v276_v44 = vpop.permute.xlu1 %275 }
  0xa8   :  { %vm352_vm14 = vcmp.eq.s32.totalorder %v276_v44, 1  ;;  %v415_v46 = vsel %vm383_vm12, 1.0, %v1365_v12 }
  0xa9   :  { %vm384_vm15 = vmand %vm160_vm13, %vm352_vm14  ;;  %v87_v45 = vpop.permute.xlu0 %86 }
  0xaa   :  { %v416_v47 = vsel %vm384_vm15, 1.0, %v1365_v12  ;;  %vm161_vm0 = vcmp.eq.s32.totalorder %v1649_v4, %v87_v45 }
  0xab   :  { %v443_v48 = vpack.c.bf16 %v416_v47, %v415_v46  ;;  %v90_v49 = vpop.permute.xlu1 %89 }
  0xac   :  { %vm162_vm3 = vcmp.eq.s32.totalorder %v1649_v4, %v90_v49 }
  0xad   :  { %v279_v50 = vpop.permute.xlu0 %278  ;;  %1174 = vmatprep.mubr.msk.bf16.mxu0 %vm471_vm7, %v443_v48 }
  0xae   :  { %vm353_vm1 = vcmp.eq.s32.totalorder %v279_v50, 1 }
  0xaf   :  { %vm385_vm2 = vmand %vm161_vm0, %vm353_vm1  ;;  %v282_v51 = vpop.permute.xlu1 %281 }
  0xb0   :  { %vm354_vm5 = vcmp.eq.s32.totalorder %v282_v51, 1  ;;  %v417_v53 = vsel %vm385_vm2, 1.0, %v1365_v12 }
  0xb1   :  { %vm386_vm6 = vmand %vm162_vm3, %vm354_vm5  ;;  %v93_v52 = vpop.permute.xlu0 %92 }
  0xb2   :  { %v418_v54 = vsel %vm386_vm6, 1.0, %v1365_v12  ;;  %vm163_vm4 = vcmp.eq.s32.totalorder %v1649_v4, %v93_v52 }
  0xb3   :  { %v444_v55 = vpack.c.bf16 %v418_v54, %v417_v53  ;;  %v96_v56 = vpop.permute.xlu1 %95 }
  0xb4   :  { %vm164_vm10 = vcmp.eq.s32.totalorder %v1649_v4, %v96_v56 }
  0xb5   :  { %v285_v57 = vpop.permute.xlu0 %284  ;;  %1175 = vmatmul.mubr.msk.bf16.gmra.mrb[8].mxu0 %vm471_vm7, %v444_v55 }
  0xb6   :  { %vm355_vm8 = vcmp.eq.s32.totalorder %v285_v57, 1 }
  0xb7   :  { %vm387_vm9 = vmand %vm163_vm4, %vm355_vm8  ;;  %v288_v58 = vpop.permute.xlu1 %287 }
  0xb8   :  { %vm356_vm11 = vcmp.eq.s32.totalorder %v288_v58, 1  ;;  %v419_v60 = vsel %vm387_vm9, 1.0, %v1365_v12 }
  0xb9   :  { %vm388_vm12 = vmand %vm164_vm10, %vm356_vm11  ;;  %v99_v59 = vpop.permute.xlu0 %98 }
  0xba   :  { %v420_v61 = vsel %vm388_vm12, 1.0, %v1365_v12  ;;  %vm165_vm13 = vcmp.eq.s32.totalorder %v1649_v4, %v99_v59 }
  0xbb   :  { %v445_v62 = vpack.c.bf16 %v420_v61, %v419_v60  ;;  %v102_v63 = vpop.permute.xlu1 %101 }
  0xbc   :  { %vm166_vm0 = vcmp.eq.s32.totalorder %v1649_v4, %v102_v63 }
  0xbd   :  { %v291_v1 = vpop.permute.xlu0 %290  ;;  %1178 = vmatprep.mubr.msk.bf16.mxu0 %vm471_vm7, %v445_v62 }
  0xbe   :  { %vm357_vm14 = vcmp.eq.s32.totalorder %v291_v1, 1 }
  0xbf   :  { %vm389_vm15 = vmand %vm165_vm13, %vm357_vm14  ;;  %v294_v2 = vpop.permute.xlu1 %293 }
  0xc0   :  { %vm358_vm1 = vcmp.eq.s32.totalorder %v294_v2, 1  ;;  %v421_v0 = vsel %vm389_vm15, 1.0, %v1365_v12 }
  0xc1   :  { %vm390_vm2 = vmand %vm166_vm0, %vm358_vm1  ;;  %v105_v3 = vpop.permute.xlu0 %104 }
  0xc2   :  { %v422_v5 = vsel %vm390_vm2, 1.0, %v1365_v12  ;;  %vm167_vm3 = vcmp.eq.s32.totalorder %v1649_v4, %v105_v3 }
  0xc3   :  { %v446_v6 = vpack.c.bf16 %v422_v5, %v421_v0  ;;  %v108_v7 = vpop.permute.xlu1 %107 }
  0xc4   :  { %vm168_vm4 = vcmp.eq.s32.totalorder %v1649_v4, %v108_v7 }
  0xc5   :  { %v297_v8 = vpop.permute.xlu0 %296  ;;  %1179 = vmatmul.mubr.msk.bf16.gmra.mrb[12].mxu0 %vm471_vm7, %v446_v6 }
  0xc6   :  { %vm359_vm5 = vcmp.eq.s32.totalorder %v297_v8, 1 }
  0xc7   :  { %vm391_vm6 = vmand %vm167_vm3, %vm359_vm5  ;;  %v300_v9 = vpop.permute.xlu1 %299 }
  0xc8   :  { %vm360_vm8 = vcmp.eq.s32.totalorder %v300_v9, 1  ;;  %v423_v11 = vsel %vm391_vm6, 1.0, %v1365_v12 }
  0xc9   :  { %vm392_vm9 = vmand %vm168_vm4, %vm360_vm8  ;;  %v111_v10 = vpop.permute.xlu0 %110 }
  0xca   :  { %v424_v13 = vsel %vm392_vm9, 1.0, %v1365_v12  ;;  %vm169_vm10 = vcmp.eq.s32.totalorder %v1649_v4, %v111_v10 }
  0xcb   :  { %v447_v14 = vpack.c.bf16 %v424_v13, %v423_v11  ;;  %v114_v15 = vpop.permute.xlu1 %113 }
  0xcc   :  { %vm170_vm13 = vcmp.eq.s32.totalorder %v1649_v4, %v114_v15 }
  0xcd   :  { %v303_v16 = vpop.permute.xlu0 %302  ;;  %1182 = vmatprep.mubr.msk.bf16.mxu0 %vm471_vm7, %v447_v14 }
  0xce   :  { %vm361_vm11 = vcmp.eq.s32.totalorder %v303_v16, 1 }
  0xcf   :  { %vm393_vm12 = vmand %vm169_vm10, %vm361_vm11  ;;  %v306_v17 = vpop.permute.xlu1 %305 }
  0xd0   :  { %vm362_vm14 = vcmp.eq.s32.totalorder %v306_v17, 1  ;;  %v425_v19 = vsel %vm393_vm12, 1.0, %v1365_v12 }
  0xd1   :  { %vm394_vm15 = vmand %vm170_vm13, %vm362_vm14  ;;  %v117_v18 = vpop.permute.xlu0 %116 }
  0xd2   :  { %v426_v20 = vsel %vm394_vm15, 1.0, %v1365_v12  ;;  %vm171_vm0 = vcmp.eq.s32.totalorder %v1649_v4, %v117_v18 }
  0xd3   :  { %v448_v21 = vpack.c.bf16 %v426_v20, %v425_v19  ;;  %v120_v22 = vpop.permute.xlu1 %119 }
  0xd4   :  { %vm172_vm3 = vcmp.eq.s32.totalorder %v1649_v4, %v120_v22 }
  0xd5   :  { %v309_v23 = vpop.permute.xlu0 %308  ;;  %1183 = vmatmul.mubr.msk.bf16.gmra.mrb[16].mxu0 %vm471_vm7, %v448_v21 }
  0xd6   :  { %vm363_vm1 = vcmp.eq.s32.totalorder %v309_v23, 1 }
  0xd7   :  { %vm395_vm2 = vmand %vm171_vm0, %vm363_vm1  ;;  %v312_v24 = vpop.permute.xlu1 %311 }
  0xd8   :  { %vm364_vm5 = vcmp.eq.s32.totalorder %v312_v24, 1  ;;  %v427_v26 = vsel %vm395_vm2, 1.0, %v1365_v12 }
  0xd9   :  { %vm396_vm6 = vmand %vm172_vm3, %vm364_vm5  ;;  %v123_v25 = vpop.permute.xlu0 %122 }
  0xda   :  { %v428_v27 = vsel %vm396_vm6, 1.0, %v1365_v12  ;;  %vm173_vm4 = vcmp.eq.s32.totalorder %v1649_v4, %v123_v25 }
  0xdb   :  { %v449_v28 = vpack.c.bf16 %v428_v27, %v427_v26  ;;  %v126_v29 = vpop.permute.xlu1 %125 }
  0xdc   :  { %vm174_vm10 = vcmp.eq.s32.totalorder %v1649_v4, %v126_v29 }
  0xdd   :  { %v315_v30 = vpop.permute.xlu0 %314  ;;  %1186 = vmatprep.mubr.msk.bf16.mxu0 %vm471_vm7, %v449_v28 }
  0xde   :  { %vm365_vm8 = vcmp.eq.s32.totalorder %v315_v30, 1 }
  0xdf   :  { %vm397_vm9 = vmand %vm173_vm4, %vm365_vm8  ;;  %v318_v31 = vpop.permute.xlu1 %317 }
  0xe0   :  { %vm366_vm11 = vcmp.eq.s32.totalorder %v318_v31, 1  ;;  %v429_v33 = vsel %vm397_vm9, 1.0, %v1365_v12 }
  0xe1   :  { %vm398_vm12 = vmand %vm174_vm10, %vm366_vm11  ;;  %v129_v32 = vpop.permute.xlu0 %128 }
  0xe2   :  { %v430_v34 = vsel %vm398_vm12, 1.0, %v1365_v12  ;;  %vm175_vm13 = vcmp.eq.s32.totalorder %v1649_v4, %v129_v32 }
  0xe3   :  { %v450_v35 = vpack.c.bf16 %v430_v34, %v429_v33  ;;  %v132_v36 = vpop.permute.xlu1 %131 }
  0xe4   :  { %vm176_vm0 = vcmp.eq.s32.totalorder %v1649_v4, %v132_v36 }
  0xe5   :  { %v321_v37 = vpop.permute.xlu0 %320  ;;  %1187 = vmatmul.mubr.msk.bf16.gmra.mrb[20].mxu0 %vm471_vm7, %v450_v35 }
  0xe6   :  { %vm367_vm14 = vcmp.eq.s32.totalorder %v321_v37, 1 }
  0xe7   :  { %vm399_vm15 = vmand %vm175_vm13, %vm367_vm14  ;;  %v324_v38 = vpop.permute.xlu1 %323 }
  0xe8   :  { %vm368_vm1 = vcmp.eq.s32.totalorder %v324_v38, 1  ;;  %v431_v41 = vsel %vm399_vm15, 1.0, %v1365_v12 }
  0xe9   :  { %vm400_vm2 = vmand %vm176_vm0, %vm368_vm1  ;;  %v135_v39 = vpop.permute.xlu0 %134 }
  0xea   :  { %v432_v42 = vsel %vm400_vm2, 1.0, %v1365_v12  ;;  %vm177_vm3 = vcmp.eq.s32.totalorder %v1649_v4, %v135_v39 }
  0xeb   :  { %v451_v43 = vpack.c.bf16 %v432_v42, %v431_v41  ;;  %v138_v44 = vpop.permute.xlu1 %137 }
  0xec   :  { %vm178_vm4 = vcmp.eq.s32.totalorder %v1649_v4, %v138_v44 }
  0xed   :  { %v327_v45 = vpop.permute.xlu0 %326  ;;  %1190 = vmatprep.mubr.msk.bf16.mxu0 %vm471_vm7, %v451_v43 }
  0xee   :  { %vm369_vm5 = vcmp.eq.s32.totalorder %v327_v45, 1 }
  0xef   :  { %vm401_vm6 = vmand %vm177_vm3, %vm369_vm5  ;;  %v330_v46 = vpop.permute.xlu1 %329 }
  0xf0   :  { %vm370_vm8 = vcmp.eq.s32.totalorder %v330_v46, 1  ;;  %v433_v48 = vsel %vm401_vm6, 1.0, %v1365_v12 }
  0xf1   :  { %vm402_vm9 = vmand %vm178_vm4, %vm370_vm8  ;;  %v141_v47 = vpop.permute.xlu0 %140 }
  0xf2   :  { %v434_v49 = vsel %vm402_vm9, 1.0, %v1365_v12  ;;  %vm179_vm10 = vcmp.eq.s32.totalorder %v1649_v4, %v141_v47 }
  0xf3   :  { %v452_v50 = vpack.c.bf16 %v434_v49, %v433_v48  ;;  %v144_v51 = vpop.permute.xlu1 %143  ;;  %v1759_v48 = vld [vmem:[%s1881_s3] ss:$0 sm:$0xff] }
  0xf4   :  { %vm180_vm13 = vcmp.eq.s32.totalorder %v1649_v4, %v144_v51 }
  0xf5   :  { %v333_v52 = vpop.permute.xlu0 %332  ;;  %1191 = vmatmul.mubr.msk.bf16.gmra.mrb[24].mxu0 %vm471_vm7, %v452_v50 }
  0xf6   :  { %vm371_vm11 = vcmp.eq.s32.totalorder %v333_v52, 1 }
  0xf7   :  { %vm403_vm12 = vmand %vm179_vm10, %vm371_vm11  ;;  %v336_v53 = vpop.permute.xlu1 %335 }
  0xf8   :  { %vm372_vm14 = vcmp.eq.s32.totalorder %v336_v53, 1  ;;  %v435_v55 = vsel %vm403_vm12, 1.0, %v1365_v12 }
  0xf9   :  { %vm404_vm15 = vmand %vm180_vm13, %vm372_vm14  ;;  %v147_v54 = vpop.permute.xlu0 %146 }
  0xfa   :  { %v436_v56 = vsel %vm404_vm15, 1.0, %v1365_v12  ;;  %vm181_vm0 = vcmp.eq.s32.totalorder %v1649_v4, %v147_v54 }
  0xfb   :  { %v453_v57 = vpack.c.bf16 %v436_v56, %v435_v55  ;;  %v150_v58 = vpop.permute.xlu1 %149 }
  0xfc   :  { %vm182_vm3 = vcmp.eq.s32.totalorder %v1649_v4, %v150_v58  ;;  %v1770_v58 = vld [vmem:[%s1882_s4] sm:$0xff] }
  0xfd   :  { %v339_v59 = vpop.permute.xlu0 %338  ;;  %1194 = vmatprep.mubr.msk.bf16.mxu0 %vm471_vm7, %v453_v57 }
  0xfe   :  { %vm373_vm1 = vcmp.eq.s32.totalorder %v339_v59, 1 }
  0xff   :  { %vm405_vm2 = vmand %vm181_vm0, %vm373_vm1  ;;  %v342_v60 = vpop.permute.xlu1 %341 }
 0x100   :  { %vm374_vm5 = vcmp.eq.s32.totalorder %v342_v60, 1  ;;  %v437_v61 = vsel %vm405_vm2, 1.0, %v1365_v12 }
 0x101   :  { %vm406_vm6 = vmand %vm182_vm3, %vm374_vm5 }
 0x102   :  { %v438_v62 = vsel %vm406_vm6, 1.0, %v1365_v12 }
 0x103   :  { %v454_v63 = vpack.c.bf16 %v438_v62, %v437_v61 }
 0x105   :  { %1195 = vmatmul.mubr.msk.bf16.gmra.mrb[28].mxu0 %vm471_vm7, %v454_v63 }
 0x106   :  { %1160 = vmatprep.mubr.f32.mxu0 %v1770_v58 }
 0x168   :  { %v1168_v1 = vpop.f32.mrb[0].mxu0 }
 0x169   :  { %v554_v2 = vpop.f32.mrb[1].mxu0 }
 0x16a   :  { %v1169_v3 = vpop.f32.mrb[2].mxu0 }
 0x16b   :  { %v682_v0 = vpack.c.bf16 %v1169_v3, %v1168_v1  ;;  %v557_v5 = vpop.f32.mrb[3].mxu0 }
 0x16c   :  { %v681_v6 = vpack.c.bf16 %v557_v5, %v554_v2 }
 0x16e   :  { %1214 = vmatprep.mubr.bf16.mxu1 %v681_v6 }
 0x16f   :  { %1215 = vmatmul.mubr.bf16.vlgmr.msra.gmra.mrb[0].mxu1 %v682_v0 }
 0x178   :  { %v1172_v7 = vpop.f32.mrb[4].mxu0 }
 0x179   :  { %v570_v8 = vpop.f32.mrb[5].mxu0 }
 0x17a   :  { %v1173_v4 = vpop.f32.mrb[6].mxu0 }
 0x17b   :  { %v684_v9 = vpack.c.bf16 %v1173_v4, %v1172_v7  ;;  %v573_v10 = vpop.f32.mrb[7].mxu0 }
 0x17c   :  { %v683_v11 = vpack.c.bf16 %v573_v10, %v570_v8 }
 0x17e   :  { %1218 = vmatprep.mubr.bf16.mxu1 %v683_v11 }
 0x17f   :  { %1219 = vmatmul.mubr.bf16.gmra.mrb[4].mxu1 %v684_v9 }
 0x188   :  { %v1176_v12 = vpop.f32.mrb[8].mxu0 }
 0x189   :  { %v586_v13 = vpop.f32.mrb[9].mxu0 }
 0x18a   :  { %v1177_v14 = vpop.f32.mrb[10].mxu0 }
 0x18b   :  { %v686_v15 = vpack.c.bf16 %v1177_v14, %v1176_v12  ;;  %v589_v16 = vpop.f32.mrb[11].mxu0 }
 0x18c   :  { %v685_v17 = vpack.c.bf16 %v589_v16, %v586_v13 }
 0x18e   :  { %1222 = vmatprep.mubr.bf16.mxu1 %v685_v17 }
 0x18f   :  { %1223 = vmatmul.mubr.bf16.gmra.mrb[8].mxu1 %v686_v15 }
 0x198   :  { %v1180_v18 = vpop.f32.mrb[12].mxu0 }
 0x199   :  { %v602_v19 = vpop.f32.mrb[13].mxu0 }
 0x19a   :  { %v1181_v20 = vpop.f32.mrb[14].mxu0 }
 0x19b   :  { %v688_v21 = vpack.c.bf16 %v1181_v20, %v1180_v18  ;;  %v605_v22 = vpop.f32.mrb[15].mxu0 }
 0x19c   :  { %v687_v23 = vpack.c.bf16 %v605_v22, %v602_v19 }
 0x19e   :  { %1226 = vmatprep.mubr.bf16.mxu1 %v687_v23 }
 0x19f   :  { %1227 = vmatmul.mubr.bf16.gmra.mrb[12].mxu1 %v688_v21 }
 0x1a8   :  { %v1184_v24 = vpop.f32.mrb[16].mxu0 }
 0x1a9   :  { %v618_v25 = vpop.f32.mrb[17].mxu0 }
 0x1aa   :  { %v1185_v26 = vpop.f32.mrb[18].mxu0 }
 0x1ab   :  { %v690_v27 = vpack.c.bf16 %v1185_v26, %v1184_v24  ;;  %v621_v28 = vpop.f32.mrb[19].mxu0 }
 0x1ac   :  { %v689_v29 = vpack.c.bf16 %v621_v28, %v618_v25 }
 0x1ae   :  { %1230 = vmatprep.mubr.bf16.mxu1 %v689_v29 }
 0x1af   :  { %1231 = vmatmul.mubr.bf16.gmra.mrb[16].mxu1 %v690_v27 }
 0x1b8   :  { %v1188_v30 = vpop.f32.mrb[20].mxu0 }
 0x1b9   :  { %v634_v31 = vpop.f32.mrb[21].mxu0 }
 0x1ba   :  { %v1189_v32 = vpop.f32.mrb[22].mxu0 }
 0x1bb   :  { %v692_v33 = vpack.c.bf16 %v1189_v32, %v1188_v30  ;;  %v637_v34 = vpop.f32.mrb[23].mxu0 }
 0x1bc   :  { %v691_v35 = vpack.c.bf16 %v637_v34, %v634_v31 }
 0x1be   :  { %1234 = vmatprep.mubr.bf16.mxu1 %v691_v35 }
 0x1bf   :  { %1235 = vmatmul.mubr.bf16.gmra.mrb[20].mxu1 %v692_v33 }
 0x1c8   :  { %v1192_v36 = vpop.f32.mrb[24].mxu0 }
 0x1c9   :  { %v650_v37 = vpop.f32.mrb[25].mxu0 }
 0x1ca   :  { %v1193_v38 = vpop.f32.mrb[26].mxu0 }
 0x1cb   :  { %v694_v39 = vpack.c.bf16 %v1193_v38, %v1192_v36  ;;  %v653_v40 = vpop.f32.mrb[27].mxu0 }
 0x1cc   :  { %v693_v41 = vpack.c.bf16 %v653_v40, %v650_v37 }
 0x1ce   :  { %1238 = vmatprep.mubr.bf16.mxu1 %v693_v41 }
 0x1cf   :  { %1239 = vmatmul.mubr.bf16.gmra.mrb[24].mxu1 %v694_v39 }
 0x1d8   :  { %v1196_v42 = vpop.f32.mrb[28].mxu0 }
 0x1d9   :  { %v666_v43 = vpop.f32.mrb[29].mxu0 }
 0x1da   :  { %v1197_v44 = vpop.f32.mrb[30].mxu0 }
 0x1db   :  { %v696_v45 = vpack.c.bf16 %v1197_v44, %v1196_v42  ;;  %v669_v46 = vpop.f32.mrb[31].mxu0 }
 0x1dc   :  { %v695_v47 = vpack.c.bf16 %v669_v46, %v666_v43 }
 0x1de   :  { %1242 = vmatprep.mubr.bf16.mxu1 %v695_v47 }
 0x1df   :  { %1243 = vmatmul.mubr.bf16.gmra.mrb[28].mxu1 %v696_v45 }
 0x242   :  { %v1216_v49 = vpop.f32.mrb[0].mxu1 }
 0x243   :  { %v811_v50 = vadd.f32 %v1216_v49, %v1759_v48  ;;  %v802_v51 = vpop.f32.mrb[1].mxu1 }
 0x244   :  { %v803_v52 = vadd.f32 %v1759_v48, %v802_v51  ;;  %v1217_v53 = vpop.f32.mrb[2].mxu1 }
 0x245   :  { %1292 = vtanh.f32 %v811_v50  ;;  %v814_v54 = vadd.f32 %v1217_v53, %v1759_v48  ;;  %v805_v55 = vpop.f32.mrb[3].mxu1 }
 0x246   :  { %1294 = vtanh.f32 %v803_v52  ;;  %v806_v56 = vadd.f32 %v1759_v48, %v805_v55 }
 0x247   :  { %1296 = vtanh.f32 %v814_v54 }
 0x248   :  { %1298 = vtanh.f32 %v806_v56 }
 0x24f   :  { %v1765_v57 = vpop.eup %1292 }
 0x250   :  { %v1772_v59 = vpop.eup %1294 }
 0x251   :  { %v1775_v60 = vpop.eup %1296 }
 0x252   :  { %v1777_v61 = vpop.eup %1298  ;;  %v1220_v62 = vpop.f32.mrb[4].mxu1  ;;  %v1252_v63 = vpack.c.bf16 %v1775_v60, %v1765_v57 }
 0x253   :  { %v827_v1 = vadd.f32 %v1220_v62, %v1759_v48  ;;  %v818_v2 = vpop.f32.mrb[5].mxu1  ;;  %v1248_v3 = vpack.c.bf16 %v1777_v61, %v1772_v59 }
 0x254   :  { %v819_v0 = vadd.f32 %v1759_v48, %v818_v2  ;;  %v1221_v5 = vpop.f32.mrb[6].mxu1 }
 0x255   :  { %1300 = vtanh.f32 %v827_v1  ;;  %v830_v6 = vadd.f32 %v1221_v5, %v1759_v48  ;;  %v821_v7 = vpop.f32.mrb[7].mxu1 }
 0x256   :  { %1302 = vtanh.f32 %v819_v0  ;;  %v822_v8 = vadd.f32 %v1759_v48, %v821_v7 }
 0x257   :  { %1304 = vtanh.f32 %v830_v6 }
 0x258   :  { %1306 = vtanh.f32 %v822_v8 }
 0x25f   :  { %v1787_v4 = vpop.eup %1300 }
 0x260   :  { %v1789_v9 = vpop.eup %1302 }
 0x261   :  { %v1791_v10 = vpop.eup %1304 }
 0x262   :  { %v1793_v11 = vpop.eup %1306  ;;  %v1224_v12 = vpop.f32.mrb[8].mxu1  ;;  %v1260_v13 = vpack.c.bf16 %v1791_v10, %v1787_v4 }
 0x263   :  { %v843_v14 = vadd.f32 %v1224_v12, %v1759_v48  ;;  %v834_v15 = vpop.f32.mrb[9].mxu1  ;;  %v1256_v16 = vpack.c.bf16 %v1793_v11, %v1789_v9 }
 0x264   :  { %v835_v17 = vadd.f32 %v1759_v48, %v834_v15  ;;  %v1225_v18 = vpop.f32.mrb[10].mxu1 }
 0x265   :  { %1308 = vtanh.f32 %v843_v14  ;;  %v846_v19 = vadd.f32 %v1225_v18, %v1759_v48  ;;  %v837_v20 = vpop.f32.mrb[11].mxu1 }
 0x266   :  { %1310 = vtanh.f32 %v835_v17  ;;  %v838_v21 = vadd.f32 %v1759_v48, %v837_v20 }
 0x267   :  { %1312 = vtanh.f32 %v846_v19 }
 0x268   :  { %1314 = vtanh.f32 %v838_v21 }
 0x26f   :  { %v1803_v22 = vpop.eup %1308 }
 0x270   :  { %v1805_v23 = vpop.eup %1310 }
 0x271   :  { %v1807_v24 = vpop.eup %1312 }
 0x272   :  { %v1809_v25 = vpop.eup %1314  ;;  %v1228_v26 = vpop.f32.mrb[12].mxu1  ;;  %v1268_v27 = vpack.c.bf16 %v1807_v24, %v1803_v22 }
 0x273   :  { %v859_v28 = vadd.f32 %v1228_v26, %v1759_v48  ;;  %v850_v29 = vpop.f32.mrb[13].mxu1  ;;  %v1264_v30 = vpack.c.bf16 %v1809_v25, %v1805_v23 }
 0x274   :  { %v851_v31 = vadd.f32 %v1759_v48, %v850_v29  ;;  %v1229_v32 = vpop.f32.mrb[14].mxu1 }
 0x275   :  { %1316 = vtanh.f32 %v859_v28  ;;  %v862_v33 = vadd.f32 %v1229_v32, %v1759_v48  ;;  %v853_v34 = vpop.f32.mrb[15].mxu1 }
 0x276   :  { %1318 = vtanh.f32 %v851_v31  ;;  %v854_v35 = vadd.f32 %v1759_v48, %v853_v34 }
 0x277   :  { %1320 = vtanh.f32 %v862_v33 }
 0x278   :  { %1322 = vtanh.f32 %v854_v35 }
 0x27f   :  { %v1819_v36 = vpop.eup %1316 }
 0x280   :  { %v1821_v37 = vpop.eup %1318 }
 0x281   :  { %v1823_v38 = vpop.eup %1320 }
 0x282   :  { %v1825_v39 = vpop.eup %1322  ;;  %v1232_v40 = vpop.f32.mrb[16].mxu1  ;;  %v1276_v41 = vpack.c.bf16 %v1823_v38, %v1819_v36 }
 0x283   :  { %v875_v42 = vadd.f32 %v1232_v40, %v1759_v48  ;;  %v866_v43 = vpop.f32.mrb[17].mxu1  ;;  %v1272_v44 = vpack.c.bf16 %v1825_v39, %v1821_v37 }
 0x284   :  { %v867_v45 = vadd.f32 %v1759_v48, %v866_v43  ;;  %v1233_v46 = vpop.f32.mrb[18].mxu1 }
 0x285   :  { %1324 = vtanh.f32 %v875_v42  ;;  %v878_v47 = vadd.f32 %v1233_v46, %v1759_v48  ;;  %v869_v49 = vpop.f32.mrb[19].mxu1 }
 0x286   :  { %1326 = vtanh.f32 %v867_v45  ;;  %v870_v50 = vadd.f32 %v1759_v48, %v869_v49 }
 0x287   :  { %1328 = vtanh.f32 %v878_v47 }
 0x288   :  { %1330 = vtanh.f32 %v870_v50 }
 0x28f   :  { %v1325_v51 = vpop.eup %1324 }
 0x290   :  { %v1327_v52 = vpop.eup %1326 }
 0x291   :  { %v1329_v53 = vpop.eup %1328 }
 0x292   :  { %v1331_v54 = vpop.eup %1330  ;;  %v1236_v55 = vpop.f32.mrb[20].mxu1  ;;  %v1250_v56 = vpack.c.bf16 %v1329_v53, %v1325_v51 }
 0x293   :  { %v891_v62 = vadd.f32 %v1236_v55, %v1759_v48  ;;  %v882_v1 = vpop.f32.mrb[21].mxu1  ;;  %v1246_v2 = vpack.c.bf16 %v1331_v54, %v1327_v52 }
 0x294   :  { %v883_v0 = vadd.f32 %v1759_v48, %v882_v1  ;;  %v1237_v5 = vpop.f32.mrb[22].mxu1 }
 0x295   :  { %1332 = vtanh.f32 %v891_v62  ;;  %v894_v6 = vadd.f32 %v1237_v5, %v1759_v48  ;;  %v885_v7 = vpop.f32.mrb[23].mxu1  ;;  %1247 = vmatprep.subr.bf16.mxu0 %v1246_v2 }
 0x296   :  { %1334 = vtanh.f32 %v883_v0  ;;  %v886_v8 = vadd.f32 %v1759_v48, %v885_v7  ;;  %1249 = vmatpush3.bf16.xpose.msra.mxu0 %v1248_v3 }
 0x297   :  { %1336 = vtanh.f32 %v894_v6  ;;  %1251 = vmatprep.subr.bf16.mxu0 %v1250_v56 }
 0x298   :  { %1338 = vtanh.f32 %v886_v8 }
 0x29e   :  { %1253 = vmatpush3.bf16.xpose.msra.mxu0 %v1252_v63 }
 0x29f   :  { %v1333_v12 = vpop.eup %1332 }
 0x2a0   :  { %v1335_v14 = vpop.eup %1334 }
 0x2a1   :  { %v1337_v15 = vpop.eup %1336 }
 0x2a2   :  { %v1339_v17 = vpop.eup %1338  ;;  %v1240_v18 = vpop.f32.mrb[24].mxu1  ;;  %v1258_v19 = vpack.c.bf16 %v1337_v15, %v1333_v12 }
 0x2a3   :  { %v907_v20 = vadd.f32 %v1240_v18, %v1759_v48  ;;  %v898_v21 = vpop.f32.mrb[25].mxu1  ;;  %v1254_v26 = vpack.c.bf16 %v1339_v17, %v1335_v14 }
 0x2a4   :  { %v899_v59 = vadd.f32 %v1759_v48, %v898_v21  ;;  %v1241_v61 = vpop.f32.mrb[26].mxu1 }
 0x2a5   :  { %1340 = vtanh.f32 %v907_v20  ;;  %v910_v3 = vadd.f32 %v1241_v61, %v1759_v48  ;;  %v901_v28 = vpop.f32.mrb[27].mxu1  ;;  %1255 = vmatprep.subr.bf16.mxu0 %v1254_v26 }
 0x2a6   :  { %1342 = vtanh.f32 %v899_v59  ;;  %v902_v57 = vadd.f32 %v1759_v48, %v901_v28  ;;  %1257 = vmatpush3.bf16.xpose.msra.mxu0 %v1256_v16 }
 0x2a7   :  { %1344 = vtanh.f32 %v910_v3  ;;  %1259 = vmatprep.subr.bf16.mxu0 %v1258_v19 }
 0x2a8   :  { %1346 = vtanh.f32 %v902_v57 }
 0x2ae   :  { %1261 = vmatpush3.bf16.xpose.msra.mxu0 %v1260_v13 }
 0x2af   :  { %v1341_v60 = vpop.eup %1340 }
 0x2b0   :  { %v1343_v63 = vpop.eup %1342 }
 0x2b1   :  { %v1345_v29 = vpop.eup %1344 }
 0x2b2   :  { %v1347_v31 = vpop.eup %1346  ;;  %v1244_v32 = vpop.f32.mrb[28].mxu1  ;;  %v1266_v33 = vpack.c.bf16 %v1345_v29, %v1341_v60 }
 0x2b3   :  { %v923_v34 = vadd.f32 %v1244_v32, %v1759_v48  ;;  %v914_v35 = vpop.f32.mrb[29].mxu1  ;;  %v1262_v40 = vpack.c.bf16 %v1347_v31, %v1343_v63 }
 0x2b4   :  { %v915_v9 = vadd.f32 %v1759_v48, %v914_v35  ;;  %v1245_v11 = vpop.f32.mrb[30].mxu1 }
 0x2b5   :  { %1348 = vtanh.f32 %v923_v34  ;;  %v926_v16 = vadd.f32 %v1245_v11, %v1759_v48  ;;  %v917_v42 = vpop.f32.mrb[31].mxu1  ;;  %1263 = vmatprep.subr.bf16.mxu0 %v1262_v40 }
 0x2b6   :  { %1350 = vtanh.f32 %v915_v9  ;;  %v918_v4 = vadd.f32 %v1759_v48, %v917_v42  ;;  %1265 = vmatpush3.bf16.xpose.msra.mxu0 %v1264_v30 }
 0x2b7   :  { %1352 = vtanh.f32 %v926_v16  ;;  %1267 = vmatprep.subr.bf16.mxu0 %v1266_v33 }
 0x2b8   :  { %1354 = vtanh.f32 %v918_v4 }
 0x2be   :  { %1269 = vmatpush3.bf16.xpose.msra.mxu0 %v1268_v27 }
 0x2bf   :  { %v1349_v10 = vpop.eup %1348 }
 0x2c0   :  { %v1351_v13 = vpop.eup %1350 }
 0x2c1   :  { %v1353_v43 = vpop.eup %1352 }
 0x2c2   :  { %v1355_v45 = vpop.eup %1354  ;;  %v1274_v46 = vpack.c.bf16 %v1353_v43, %v1349_v10 }
 0x2c3   :  { %v1270_v47 = vpack.c.bf16 %v1355_v45, %v1351_v13 }
 0x2c5   :  { %1271 = vmatprep.subr.bf16.mxu0 %v1270_v47 }
 0x2c6   :  { %1273 = vmatpush3.bf16.xpose.msra.mxu0 %v1272_v44 }
 0x2c7   :  { %1275 = vmatprep.subr.bf16.mxu0 %v1274_v46 }
 0x2ce   :  { %1277 = vmatpush3.bf16.xpose.msra.mxu0 %v1276_v41 }
 0x2d5   :  { %1161 = vmatmul.mubr.f32.vlgmr.msra.gmra.mrb[32].mxu0 %v1770_v58 }
 0x3a8   :  { %v1028_v48 = vpop.f32.mrb[32].mxu0 }
 0x3a9   :  { %1033 = vmax.xlane.f32.xlu0 %v1028_v48  ;;  %v1030_v22 = vpop.f32.mrb[33].mxu0 }
 0x3aa   :  { %1043 = vmax.xlane.f32.xlu1 %v1030_v22 }
 0x436   :  { %v1034_v23 = vpop.xlane.xlu0 %1033 }
 0x437   :  { %v1035_v24 = vsub.f32 %v1028_v48, %v1034_v23  ;;  %v1044_v25 = vpop.xlane.xlu1 %1043 }
 0x438   :  { %v1045_v27 = vsub.f32 %v1030_v22, %v1044_v25 }
 0x439   :  { %v1036_v30 = vmul.f32 1.442695, %v1035_v24 }
 0x43a   :  { %v1046_v49 = vmul.f32 1.442695, %v1045_v27 }
 0x43b   :  { %1356 = vpow2.f32 %v1036_v30 }
 0x43c   :  { %1358 = vpow2.f32 %v1046_v49 }
 0x445   :  { %v1357_v37 = vpop.eup %1356 }
 0x446   :  { %1038 = vadd.xlane.f32.xlu0 %v1357_v37  ;;  %v1359_v39 = vpop.eup %1358 }
 0x44a   :  { %1048 = vadd.xlane.f32.xlu0 %v1359_v39 }
 0x4d3   :  { %v1039_v36 = vpop.xlane.xlu0 %1038 }
 0x4d4   :  { %1360 = vrcp.f32 %v1039_v36 }
 0x4d7   :  { %v1049_v38 = vpop.xlane.xlu0 %1048 }
 0x4d8   :  { %1362 = vrcp.f32 %v1049_v38 }
 0x4de   :  { %v1361_v58 = vpop.eup %1360 }
 0x4df   :  { %v1041_v41 = vmul.f32 %v1361_v58, %v1357_v37 }
 0x4e1   :  { %1042 = vst [vmem:[%s1883_s5] sm:$0xff] %v1041_v41 }
 0x4e2   :  { %v1363_v44 = vpop.eup %1362 }
 0x4e3   :  { %v1051_v50 = vmul.f32 %v1363_v44, %v1359_v39 }
 0x4e5   :  { %1085 = vst [vmem:[%s1883_s5 + $0x8] sm:$0xff] %v1051_v50 }

</bundles_post_ra>
